<compile_context>
chip_gen: v5e
topology: v5e:2x2
jax: 0.10.0
libtpu: 0.0.40
codegen_flags: <defaults>
</compile_context>

<pallas_src>
import jax
import jax.numpy as jnp
from jax.experimental import pallas as pl
from jax.experimental.pallas import tpu as pltpu


LANE = 128            # lane width (last dim) of a vreg
SUBLANE = 8           # sublane width (second-to-last dim)
SMALL_BATCH_MAX = 1024  # <= this: ungridded single-call path
BATCH_TILE = 2048       # max rows per grid step on the large-batch path


def _round_up(x, m):
    return (x + m - 1) // m * m


def dqn_kernel(x_ref, w1_ref, b1_ref, w2_ref, b2_ref, w3_ref, b3_ref,
               w4_ref, b4_ref, o_ref):
    # f32 -> bf16 cast done in-kernel on the VPU (wrapper streams raw f32 x).
    x = x_ref[...].astype(jnp.bfloat16)
    # Layer 1: Linear(in_dim, 256) + ReLU   (bf16 x bf16 -> f32 acc on MXU)
    h = jnp.dot(x, w1_ref[...], preferred_element_type=jnp.float32)
    h = jnp.maximum(h + b1_ref[...], 0.0)
    # Layer 2: Linear(256, 128) + ReLU
    h = jnp.dot(h.astype(jnp.bfloat16), w2_ref[...],
                preferred_element_type=jnp.float32)
    h = jnp.maximum(h + b2_ref[...], 0.0)
    # Layer 3: Linear(128, 64) + ReLU  (true width -> no padded MXU FLOPs)
    h = jnp.dot(h.astype(jnp.bfloat16), w3_ref[...],
                preferred_element_type=jnp.float32)
    h = jnp.maximum(h + b3_ref[...], 0.0)
    # Layer 4: Linear(64, 128-padded) (true width n_actions), no activation.
    h = jnp.dot(h.astype(jnp.bfloat16), w4_ref[...],
                preferred_element_type=jnp.float32)
    o_ref[...] = (h + b4_ref[...]).astype(o_ref.dtype)


def init_params(key, input_dim, n_actions):
    """PyTorch-Linear-style init: U(-1/sqrt(fan_in), 1/sqrt(fan_in)). Unpadded, f32."""
    dims = [input_dim, 256, 128, 64, n_actions]
    params = []
    for i in range(4):
        fan_in, fan_out = dims[i], dims[i + 1]
        key, kw, kb = jax.random.split(key, 3)
        bound = 1.0 / jnp.sqrt(float(fan_in))
        w = jax.random.uniform(kw, (fan_in, fan_out), jnp.float32, -bound, bound)
        b = jax.random.uniform(kb, (fan_out,), jnp.float32, -bound, bound)
        params.append((w, b))
    return params


def pad_and_cast_params(params):
    """Keep true widths for internal layers; only the FINAL layer's output dim is
    zero-padded to a multiple of 128 lanes (lane-dense output store).
    Weights -> bf16 (MXU operands); biases -> f32 (1, out) for the VPU add."""
    padded = []
    last = len(params) - 1
    for i, (w, b) in enumerate(params):
        fi, fo = w.shape
        fo_p = _round_up(fo, LANE) if i == last else fo
        w_p = jnp.zeros((fi, fo_p), jnp.float32).at[:, :fo].set(w)
        b_p = jnp.zeros((1, fo_p), jnp.float32).at[0, :fo].set(b)
        padded.append((w_p.astype(jnp.bfloat16), b_p))
    return padded


def dqn_forward(x, padded_params, n_actions):
    """x: (batch, H, W) float32. Returns (batch, n_actions) float32."""
    (w1, b1), (w2, b2), (w3, b3), (w4, b4) = padded_params
    batch = x.shape[0]
    # Reshape is free; NO pad/cast here — the kernel reads raw f32 activations.
    x2d = x.reshape(batch, -1).astype(jnp.float32)
    in_dim = x2d.shape[1]
    out_pad = w4.shape[1]
    weight_args = (w1, b1, w2, b2, w3, b3, w4, b4)

    if batch <= SMALL_BATCH_MAX:
        # ---- Small batch: ungridded call, everything resident in VMEM. ----
        b_pad = _round_up(batch, SUBLANE)
        if b_pad != batch:
            x2d = jnp.pad(x2d, ((0, b_pad - batch), (0, 0)))
        vmem = pl.BlockSpec(memory_space=pltpu.MemorySpace.VMEM)
        out = pl.pallas_call(
            dqn_kernel,
            out_shape=jax.ShapeDtypeStruct((b_pad, out_pad), jnp.bfloat16),
            in_specs=[vmem] * 9,
            out_specs=vmem,
        )(x2d, *weight_args)
    else:
        # ---- Large batch: batch-tiled "parallel" grid; weights stay resident. ----
        # Core-aware tile: always >= 2 grid steps (v7x has 2 TCs), capped at
        # BATCH_TILE. Per-step VMEM at 2048 rows is ~0.5 MiB in + 0.5 MiB out
        # (double-buffered) + ~0.1 MiB weights — far under the scoped limit.
        tile = min(BATCH_TILE, _round_up(pl.cdiv(batch, 2), 512))
        nb = pl.cdiv(batch, tile)  # no remainder pad: Pallas masks the partial last block

        def resident(shape):
            # Constant block index -> block never changes -> no re-DMA per step.
            return pl.BlockSpec(shape, lambda i: (0, 0))

        out = pl.pallas_call(
            dqn_kernel,
            out_shape=jax.ShapeDtypeStruct((batch, out_pad), jnp.bfloat16),
            grid=(nb,),
            in_specs=[
                pl.BlockSpec((tile, in_dim), lambda i: (i, 0)),
                resident(w1.shape), resident(b1.shape),
                resident(w2.shape), resident(b2.shape),
                resident(w3.shape), resident(b3.shape),
                resident(w4.shape), resident(b4.shape),
            ],
            out_specs=pl.BlockSpec((tile, out_pad), lambda i: (i, 0)),
            compiler_params=pltpu.CompilerParams(
                dimension_semantics=("parallel",)),
        )(x2d, *weight_args)

    return out[:batch, :n_actions].astype(jnp.float32)


def dqn_reference(x, params):
    """Plain-JAX reference with the same bf16-operand / f32-accumulate math."""
    h = x.reshape(x.shape[0], -1)
    for i, (w, b) in enumerate(params):
        h = jnp.dot(h.astype(jnp.bfloat16), w.astype(jnp.bfloat16),
                    preferred_element_type=jnp.float32) + b.reshape(1, -1)
        if i < len(params) - 1:
            h = jnp.maximum(h, 0.0)
    return h


if __name__ == "__main__":
    key = jax.random.PRNGKey(0)
    # DQN(input_shape=(8, 8), n_actions=4)
    input_shape = (8, 8)
    n_actions = 4
    input_dim = input_shape[0] * input_shape[1]

    key, kx, kxb, kp = jax.random.split(key, 4)
    params = init_params(kp, input_dim, n_actions)
    padded_params = pad_and_cast_params(params)

    # Small-batch path (ungridded, everything in VMEM).
    batch = 8
    x = jax.random.normal(kx, (batch, *input_shape), jnp.float32)
    out = jax.block_until_ready(dqn_forward(x, padded_params, n_actions))
    ref = dqn_reference(x, params)
    assert out.shape == (batch, n_actions)
    assert jnp.allclose(out, ref, atol=2e-2, rtol=2e-2), "small-batch mismatch"

    # Large-batch path (batch-tiled 'parallel' grid, non-multiple batch ->
    # exercises the masked partial last block, no remainder pad).
    batch_big = 2600
    x_big = jax.random.normal(kxb, (batch_big, *input_shape), jnp.float32)
    out_big = jax.block_until_ready(dqn_forward(x_big, padded_params, n_actions))
    ref_big = dqn_reference(x_big, params)
    assert out_big.shape == (batch_big, n_actions)
    assert jnp.allclose(out_big, ref_big, atol=2e-2, rtol=2e-2), "large-batch mismatch"

    print("KERNEL_OK")
</pallas_src>

<mosaic_0001>
module attributes {stable_mosaic.version = 11 : i64} {
  func.func @dqn_kernel(%arg0: memref<8x64xf32, #tpu.memory_space<vmem>>, %arg1: memref<64x256xbf16, #tpu.memory_space<vmem>>, %arg2: memref<1x256xf32, #tpu.memory_space<vmem>>, %arg3: memref<256x128xbf16, #tpu.memory_space<vmem>>, %arg4: memref<1x128xf32, #tpu.memory_space<vmem>>, %arg5: memref<128x64xbf16, #tpu.memory_space<vmem>>, %arg6: memref<1x64xf32, #tpu.memory_space<vmem>>, %arg7: memref<64x128xbf16, #tpu.memory_space<vmem>>, %arg8: memref<1x128xf32, #tpu.memory_space<vmem>>, %arg9: memref<8x128xbf16, #tpu.memory_space<vmem>>) attributes {dimension_semantics = [], scalar_prefetch = 0 : i64, scratch_operands = 0 : i64, tpu.core_type = #tpu.core_type<tc>} {
    %c0 = arith.constant 0 : index
    %c0_0 = arith.constant 0 : index
    %0 = vector.load %arg0[%c0, %c0_0] : memref<8x64xf32, #tpu.memory_space<vmem>>, vector<8x64xf32>
    %1 = arith.truncf %0 : vector<8x64xf32> to vector<8x64xbf16>
    %c0_1 = arith.constant 0 : index
    %c0_2 = arith.constant 0 : index
    %2 = vector.load %arg1[%c0_1, %c0_2] : memref<64x256xbf16, #tpu.memory_space<vmem>>, vector<64x256xbf16>
    %cst = arith.constant dense<0.000000e+00> : vector<8x256xf32>
    %3 = tpu.matmul %1, %2, %cst {dimension_numbers = #tpu.dot_dimension_numbers<[1], [0], [0], [1], [0, 0, 1, 1], [], []>} : vector<8x64xbf16>, vector<64x256xbf16>, vector<8x256xf32> -> vector<8x256xf32>
    %c0_3 = arith.constant 0 : index
    %c0_4 = arith.constant 0 : index
    %4 = vector.load %arg2[%c0_3, %c0_4] : memref<1x256xf32, #tpu.memory_space<vmem>>, vector<1x256xf32>
    %5 = vector.broadcast %4 : vector<1x256xf32> to vector<8x256xf32>
    %6 = arith.addf %3, %5 : vector<8x256xf32>
    %cst_5 = arith.constant 0.000000e+00 : f32
    %7 = vector.broadcast %cst_5 : f32 to vector<8x256xf32>
    %8 = arith.maximumf %6, %7 : vector<8x256xf32>
    %9 = arith.truncf %8 : vector<8x256xf32> to vector<8x256xbf16>
    %c0_6 = arith.constant 0 : index
    %c0_7 = arith.constant 0 : index
    %10 = vector.load %arg3[%c0_6, %c0_7] : memref<256x128xbf16, #tpu.memory_space<vmem>>, vector<256x128xbf16>
    %cst_8 = arith.constant dense<0.000000e+00> : vector<8x128xf32>
    %11 = tpu.matmul %9, %10, %cst_8 {dimension_numbers = #tpu.dot_dimension_numbers<[1], [0], [0], [1], [0, 0, 1, 1], [], []>} : vector<8x256xbf16>, vector<256x128xbf16>, vector<8x128xf32> -> vector<8x128xf32>
    %c0_9 = arith.constant 0 : index
    %c0_10 = arith.constant 0 : index
    %12 = vector.load %arg4[%c0_9, %c0_10] : memref<1x128xf32, #tpu.memory_space<vmem>>, vector<1x128xf32>
    %13 = vector.broadcast %12 : vector<1x128xf32> to vector<8x128xf32>
    %14 = arith.addf %11, %13 : vector<8x128xf32>
    %cst_11 = arith.constant 0.000000e+00 : f32
    %15 = vector.broadcast %cst_11 : f32 to vector<8x128xf32>
    %16 = arith.maximumf %14, %15 : vector<8x128xf32>
    %17 = arith.truncf %16 : vector<8x128xf32> to vector<8x128xbf16>
    %c0_12 = arith.constant 0 : index
    %c0_13 = arith.constant 0 : index
    %18 = vector.load %arg5[%c0_12, %c0_13] : memref<128x64xbf16, #tpu.memory_space<vmem>>, vector<128x64xbf16>
    %cst_14 = arith.constant dense<0.000000e+00> : vector<8x64xf32>
    %19 = tpu.matmul %17, %18, %cst_14 {dimension_numbers = #tpu.dot_dimension_numbers<[1], [0], [0], [1], [0, 0, 1, 1], [], []>} : vector<8x128xbf16>, vector<128x64xbf16>, vector<8x64xf32> -> vector<8x64xf32>
    %c0_15 = arith.constant 0 : index
    %c0_16 = arith.constant 0 : index
    %20 = vector.load %arg6[%c0_15, %c0_16] : memref<1x64xf32, #tpu.memory_space<vmem>>, vector<1x64xf32>
    %21 = vector.broadcast %20 : vector<1x64xf32> to vector<8x64xf32>
    %22 = arith.addf %19, %21 : vector<8x64xf32>
    %cst_17 = arith.constant 0.000000e+00 : f32
    %23 = vector.broadcast %cst_17 : f32 to vector<8x64xf32>
    %24 = arith.maximumf %22, %23 : vector<8x64xf32>
    %25 = arith.truncf %24 : vector<8x64xf32> to vector<8x64xbf16>
    %c0_18 = arith.constant 0 : index
    %c0_19 = arith.constant 0 : index
    %26 = vector.load %arg7[%c0_18, %c0_19] : memref<64x128xbf16, #tpu.memory_space<vmem>>, vector<64x128xbf16>
    %cst_20 = arith.constant dense<0.000000e+00> : vector<8x128xf32>
    %27 = tpu.matmul %25, %26, %cst_20 {dimension_numbers = #tpu.dot_dimension_numbers<[1], [0], [0], [1], [0, 0, 1, 1], [], []>} : vector<8x64xbf16>, vector<64x128xbf16>, vector<8x128xf32> -> vector<8x128xf32>
    %c0_21 = arith.constant 0 : index
    %c0_22 = arith.constant 0 : index
    %28 = vector.load %arg8[%c0_21, %c0_22] : memref<1x128xf32, #tpu.memory_space<vmem>>, vector<1x128xf32>
    %29 = vector.broadcast %28 : vector<1x128xf32> to vector<8x128xf32>
    %30 = arith.addf %27, %29 : vector<8x128xf32>
    %31 = arith.truncf %30 : vector<8x128xf32> to vector<8x128xbf16>
    %c0_23 = arith.constant 0 : index
    %c0_24 = arith.constant 0 : index
    %32 = vector.load %arg9[%c0_23, %c0_24] : memref<8x128xbf16, #tpu.memory_space<vmem>>, vector<8x128xbf16>
    tpu.vector_store %arg9[%c0_23, %c0_24], %31 {strides = array<i32>} : memref<8x128xbf16, #tpu.memory_space<vmem>>, vector<8x128xbf16>,
    return
  }
}

</mosaic_0001>

<bundles_post_ra>
// kernel: tpu_custom_call.1
= control target key start
LH: loop header
LB: loop body
LE: loop exit
PB: predicated region body
PF: predicated region fallthrough
CT: control target
= control target key end

     0   :  { %14 = vsyncpa [#allocation3], 0  ;;  %s940_s0 = inlined_call_operand.hbm [shape: f32[8,64], index: 0, kind: input, shape index: {}]   ;;  %s941_s1 = inlined_call_operand.vmem [shape: bf16[64,256], index: 1, kind: input, shape index: {}]   ;;  %s942_s2 = inlined_call_operand.hbm [shape: f32[1,256], index: 2, kind: input, shape index: {}]   ;;  %s943_s3 = inlined_call_operand.hbm [shape: bf16[256,128], index: 3, kind: input, shape index: {}]   ;;  %s944_s4 = inlined_call_operand.vmem [shape: f32[1,128], index: 4, kind: input, shape index: {}]   ;;  %s945_s5 = inlined_call_operand.vmem [shape: bf16[128,64], index: 5, kind: input, shape index: {}]   ;;  %s946_s6 = inlined_call_operand.vmem [shape: f32[1,64], index: 6, kind: input, shape index: {}]   ;;  %s947_s7 = inlined_call_operand.vmem [shape: bf16[64,128], index: 7, kind: input, shape index: {}]   ;;  %s948_s8 = inlined_call_operand.vmem [shape: f32[1,128], index: 8, kind: input, shape index: {}]   ;;  %s949_s9 = inlined_call_operand.hbm [shape: bf16[8,128], index: 9, kind: output, shape index: {}]  }
   0x1   :  { %15 = vsyncpa [#allocation6], 0  ;;  %s35_s11 = sshll.u32 %s942_s2, 4  ;;  %s36_s11 = int_to_ptr.hbm [resolvable:$true] %s35_s11 }
   0x2   :  { %16 = vsyncpa [#allocation4], 0  ;;  %s776_s12 = smov [#allocation5]   ;;  %s22_s16 = sshll.u32 %s940_s0, 4  ;;  %s23_s16 = int_to_ptr.hbm [resolvable:$true] %s22_s16 }
   0x3   :  { %s37_s13 = sshll.u32 %s776_s12, 4  ;;  %s777_s17 = smov [#allocation2]   ;;  %s38_s13 = int_to_ptr.vmem [resolvable:$true] %s37_s13 }
   0x4   :  { %40 = dma.hbm_to_vmem [thread:$0]  %s36_s11, 32, %s38_s13, [#allocation6]  }
   0x5   :  { %s24_s18 = sshll.u32 %s777_s17, 4  ;;  %s45_s21 = sshll.u32 %s943_s3, 4  ;;  %s25_s18 = int_to_ptr.vmem [resolvable:$true] %s24_s18  ;;  %s46_s21 = int_to_ptr.hbm [resolvable:$true] %s45_s21 }
   0x6   :  { %27 = dma.hbm_to_vmem [thread:$0]  %s23_s16, 128, %s25_s18, [#allocation3]  }
   0x7   :  { %s778_s2 = smov [#allocation7]   ;;  %s779_s23 = smov 64  }
   0x8   :  { %s47_s22 = sshll.u32 %s778_s2, 4  ;;  %s780_s24 = smov 4   ;;  %s48_s22 = int_to_ptr.vmem [resolvable:$true] %s47_s22 }
   0x9   :  { %53 = dma.hbm_to_vmem [thread:$0]  %s46_s21, 2048, %s48_s22, [#allocation6], %s779_s23, %s779_s23, %s780_s24  }
   0xa   :  { %770 = dma.done.wait [#allocation3], 128  }
   0xb   :  { %771 = vsyncadd [#allocation3], 4294967168 }
   0xc   :  { %772 = dma.done.wait [#allocation6], 2080  }
   0xd   :  { %773 = vsyncadd [#allocation6], 4294965216  ;;  %v508_v0 = vld [vmem:[%s941_s1 + $0x30] sm:$0xf]  ;;  %v636_v1 = vld [vmem:[%s941_s1 + $0x34] sm:$0xf0] }
   0xe   :  { %v635_v2 = vld [vmem:[%s941_s1 + $0x34] sm:$0xf]  ;;  %v509_v3 = vor.u32 %v636_v1, %v508_v0  ;;  %v510_v4 = vld [vmem:[%s941_s1 + $0x38] sm:$0xf0]  ;;  %v500_v5 = vld [vmem:[%s941_s1 + $0x20] sm:$0xf] }
   0xf   :  { %v634_v6 = vld [vmem:[%s941_s1 + $0x24] sm:$0xf0]  ;;  %v513_v7 = vor.u32 %v635_v2, %v510_v4  ;;  %v633_v8 = vld [vmem:[%s941_s1 + $0x24] sm:$0xf]  ;;  %v502_v9 = vld [vmem:[%s941_s1 + $0x28] sm:$0xf0] }
  0x10   :  { %141 = vmatpush.bf16.msra.mxu0 %v509_v3  ;;  %v501_v10 = vor.u32 %v634_v6, %v500_v5  ;;  %v505_v11 = vor.u32 %v633_v8, %v502_v9  ;;  %v492_v12 = vld [vmem:[%s941_s1 + $0x10] sm:$0xf]  ;;  %v632_v13 = vld [vmem:[%s941_s1 + $0x14] sm:$0xf0]  ;;  %v631_v14 = vld [vmem:[%s941_s1 + $0x14] sm:$0xf] }
  0x11   :  { %154 = vmatpush.bf16.msra.mxu1 %v513_v7  ;;  %v494_v15 = vld [vmem:[%s941_s1 + $0x18] sm:$0xf0]  ;;  %v644_v16 = vld [vmem:[#allocation7 + $0x38] sm:$0xff]  ;;  %v493_v18 = vor.u32 %v632_v13, %v492_v12  ;;  %v486_v25 = vld [vmem:[%s941_s1 + $0x8] sm:$0xf0]  ;;  %vm133_vm0 = vcmask 523264  }
  0x12   :  { %v652_v17 = vld [vmem:[#allocation7 + $0x78] sm:$0xff]  ;;  %299 = vmatpush.bf16.msra.mxu2 %v644_v16  ;;  %v643_v19 = vld [vmem:[#allocation7 + $0x30] sm:$0xff]  ;;  %v497_v20 = vor.u32 %v631_v14, %v494_v15  ;;  %v642_v28 = vld [vmem:[#allocation7 + $0x28] sm:$0xff]  ;;  %s781_s12 = smov [#allocation8]   ;;  %s471_s15 = sshll.u32 %s949_s9, 4  ;;  %s472_s15 = int_to_ptr.hbm [resolvable:$true] %s471_s15 }
  0x13   :  { %v484_v21 = vld [vmem:[%s941_s1] sm:$0xf]  ;;  %v630_v22 = vld [vmem:[%s941_s1 + $0x4] sm:$0xf0]  ;;  %312 = vmatpush.bf16.msra.mxu3 %v652_v17  ;;  %v629_v24 = vld [vmem:[%s941_s1 + $0x4] sm:$0xf] }
  0x14   :  { %142 = vmatpush.bf16.msra.mxu0 %v501_v10  ;;  %v651_v23 = vld [vmem:[#allocation7 + $0x70] sm:$0xff]  ;;  %v485_v26 = vor.u32 %v630_v22, %v484_v21  ;;  %v489_v29 = vor.u32 %v629_v24, %v486_v25  ;;  %v650_v30 = vld [vmem:[#allocation7 + $0x68] sm:$0xff]  ;;  %v641_v32 = vld [vmem:[#allocation7 + $0x20] sm:$0xff]  ;;  %s469_s13 = sshll.u32 %s781_s12, 4  ;;  %s470_s13 = int_to_ptr.vmem [resolvable:$true] %s469_s13 }
  0x15   :  { %155 = vmatpush.bf16.msra.mxu1 %v505_v11  ;;  %v77_v27 = vld [vmem:[#allocation2] sm:$0xff]  ;;  %v649_v33 = vld [vmem:[#allocation7 + $0x60] sm:$0xff]  ;;  %v638_v38 = vld [vmem:[#allocation7 + $0x8] sm:$0xff] }
  0x16   :  { %300 = vmatpush.bf16.msra.mxu2 %v643_v19  ;;  %v78_v31 = vpack.c.bf16 %v77_v27, %v77_v27  ;;  %v640_v34 = vld [vmem:[#allocation7 + $0x18] sm:$0xff]  ;;  %v639_v36 = vld [vmem:[#allocation7 + $0x10] sm:$0xff]  ;;  %v646_v39 = vld [vmem:[#allocation7 + $0x48] sm:$0xff] }
  0x17   :  { %313 = vmatpush.bf16.msra.mxu3 %v651_v23  ;;  %v648_v35 = vld [vmem:[#allocation7 + $0x58] sm:$0xff]  ;;  %v647_v37 = vld [vmem:[#allocation7 + $0x50] sm:$0xff]  ;;  %v637_v40 = vld [vmem:[#allocation7] sm:$0xff] }
  0x18   :  { %143 = vmatpush.bf16.msra.mxu0 %v493_v18  ;;  %v645_v41 = vld [vmem:[#allocation7 + $0x40] sm:$0xff]  ;;  %v660_v42 = vld [vmem:[%s945_s5 + $0x38] sm:$0xff]  ;;  %v657_v45 = vld [vmem:[%s945_s5 + $0x20] sm:$0xff] }
  0x19   :  { %156 = vmatpush.bf16.msra.mxu1 %v497_v20  ;;  %v659_v43 = vld [vmem:[%s945_s5 + $0x30] sm:$0xff]  ;;  %v658_v44 = vld [vmem:[%s945_s5 + $0x28] sm:$0xff]  ;;  %v656_v46 = vld [vmem:[%s945_s5 + $0x18] sm:$0xff] }
  0x1a   :  { %301 = vmatpush.bf16.msra.mxu2 %v642_v28  ;;  %v87_v47 = vld [vmem:[#allocation5] sm:$0x3]  ;;  %v655_v48 = vld [vmem:[%s945_s5 + $0x10] sm:$0xff]  ;;  %v653_v62 = vld [vmem:[%s945_s5] sm:$0xff] }
  0x1b   :  { %314 = vmatpush.bf16.msra.mxu3 %v650_v30  ;;  %v89_v49 = vperm.slane %v87_v47, 0  ;;  %v90_v50 = vperm.slane %v87_v47, 1  ;;  %v654_v61 = vld [vmem:[%s945_s5 + $0x8] sm:$0xff]  ;;  %v664_v63 = vld [vmem:[%s947_s7 + $0x18] sm:$0xff]  ;;  %v663_v0 = vld [vmem:[%s947_s7 + $0x10] sm:$0xff] }
  0x1c   :  { %144 = vmatpush.bf16.msra.mxu0 %v485_v26  ;;  %v662_v1 = vld [vmem:[%s947_s7 + $0x8] sm:$0xff]  ;;  %v671_v2 = vld [vmem:[%s944_s4] ss:$0 sm:$0xff] }
  0x1d   :  { %157 = vmatpush.bf16.msra.mxu1 %v489_v29  ;;  %v661_v11 = vld [vmem:[%s947_s7] sm:$0xff] }
  0x1e   :  { %302 = vmatpush.bf16.msra.mxu2 %v641_v32  ;;  %v672_v12 = vld [vmem:[%s946_s6] ss:$0 sm:$0xff] }
  0x1f   :  { %514 = vmatmul.msk.bf16.vlgmr.msra.gmra.mxu0 %vm133_vm0, %v78_v31  ;;  %315 = vmatpush.bf16.msra.mxu3 %v649_v33  ;;  %v673_v18 = vld [vmem:[%s948_s8] ss:$0 sm:$0xff] }
  0x20   :  { %515 = vmatmul.msk.bf16.vlgmr.msra.gmra.mxu1 %vm133_vm0, %v78_v31  ;;  %395 = vmatpush.bf16.msrb.mxu0 %v660_v42 }
  0x21   :  { %453 = vmatpush.bf16.msrb.mxu1 %v664_v63 }
  0x22   :  { %303 = vmatpush.bf16.msra.mxu2 %v640_v34 }
  0x23   :  { %316 = vmatpush.bf16.msra.mxu3 %v648_v35 }
  0x24   :  { %396 = vmatpush.bf16.msrb.mxu0 %v659_v43 }
  0x25   :  { %454 = vmatpush.bf16.msrb.mxu1 %v663_v0 }
  0x26   :  { %304 = vmatpush.bf16.msra.mxu2 %v639_v36 }
  0x27   :  { %317 = vmatpush.bf16.msra.mxu3 %v647_v37 }
  0x28   :  { %397 = vmatpush.bf16.msrb.mxu0 %v658_v44 }
  0x29   :  { %455 = vmatpush.bf16.msrb.mxu1 %v662_v1 }
  0x2a   :  { %305 = vmatpush.bf16.msra.mxu2 %v638_v38 }
  0x2b   :  { %318 = vmatpush.bf16.msra.mxu3 %v646_v39 }
  0x2c   :  { %398 = vmatpush.bf16.msrb.mxu0 %v657_v45 }
  0x2d   :  { %456 = vmatpush.bf16.msrb.mxu1 %v661_v11 }
  0x2e   :  { %306 = vmatpush.bf16.msra.mxu2 %v637_v40 }
  0x2f   :  { %319 = vmatpush.bf16.msra.mxu3 %v645_v41 }
  0x30   :  { %399 = vmatpush.bf16.msrb.mxu0 %v656_v46 }
  0x34   :  { %400 = vmatpush.bf16.msrb.mxu0 %v655_v48 }
  0x38   :  { %401 = vmatpush.bf16.msrb.mxu0 %v654_v61 }
  0x3c   :  { %402 = vmatpush.bf16.msrb.mxu0 %v653_v62 }
  0x9c   :  { %v146_v51 = vpop.f32.mrf.mxu0 }
  0x9d   :  { %v147_v52 = vadd.f32 %v146_v51, %v89_v49  ;;  %v159_v53 = vpop.f32.mrf.mxu1 }
  0x9e   :  { %v160_v54 = vadd.f32 %v159_v53, %v90_v50 }
  0x9f   :  { %v163_v55 = vmax.f32 %v147_v52, 0.0 }
  0xa0   :  { %v164_v56 = vmax.f32 %v160_v54, 0.0 }
  0xa1   :  { %v165_v57 = vpack.c.bf16 %v163_v55, %v163_v55 }
  0xa2   :  { %v166_v58 = vpack.c.bf16 %v164_v56, %v164_v56 }
  0xa3   :  { %307 = vmatmul.bf16.vlgmr.msra.gmra.mxu2 %v165_v57 }
  0xa4   :  { %320 = vmatmul.bf16.vlgmr.msra.gmra.mxu3 %v166_v58  ;;  %v148_v59 = vpop.f32.mrf.mxu0 }
  0xa5   :  { %v161_v60 = vpop.f32.mrf.mxu1 }
 0x126   :  { %v308_v3 = vpop.f32.mrf.mxu2 }
 0x127   :  { %v309_v4 = vadd.f32 %v671_v2, %v308_v3  ;;  %v321_v5 = vpop.f32.mrf.mxu3 }
 0x129   :  { %v322_v6 = vadd.f32 %v321_v5, %v309_v4 }
 0x12b   :  { %v325_v7 = vmax.f32 %v322_v6, 0.0 }
 0x12d   :  { %v326_v8 = vpack.c.bf16 %v325_v7, %v325_v7 }
 0x12e   :  { %v310_v9 = vpop.f32.mrf.mxu2 }
 0x12f   :  { %v323_v10 = vpop.f32.mrf.mxu3  ;;  %403 = vmatmul.bf16.vlgmr.msrb.gmra.mxu0 %v326_v8 }
 0x1ac   :  { %v404_v13 = vpop.f32.mrf.mxu0 }
 0x1ad   :  { %v405_v14 = vadd.f32 %v672_v12, %v404_v13 }
 0x1af   :  { %v408_v15 = vmax.f32 %v405_v14, 0.0 }
 0x1b1   :  { %v409_v16 = vpack.c.bf16 %v408_v15, %v408_v15 }
 0x1b3   :  { %628 = vmatmul.msk.bf16.vlgmr.msrb.gmra.mxu1 %vm133_vm0, %v409_v16 }
 0x1b4   :  { %v406_v17 = vpop.f32.mrf.mxu0 }
 0x230   :  { %v458_v19 = vpop.f32.mrf.mxu1 }
 0x231   :  { %v459_v20 = vadd.f32 %v673_v18, %v458_v19 }
 0x233   :  { %v462_v21 = vpack.c.bf16 %v459_v20, %v459_v20 }
 0x235   :  { %463 = vst [vmem:[#allocation8] sm:$0xf] %v462_v21 }
 0x236   :  { %474 = dma.vmem_to_hbm [thread:$0]  %s470_s13, 64, %s472_s15, [#allocation4]  }
 0x238   :  { %v460_v22 = vpop.f32.mrf.mxu1 }
 0x239   :  { %774 = dma.done.wait [#allocation4], 64  }
 0x23a   :  { %775 = vsyncadd [#allocation4], 4294967232 }
 0x23b   :  { %479 = vsyncpa [#allocation3], 1 }
 0x23c   :  { %480 = vsyncpa [#allocation6], 1 }
 0x23d   :  { %481 = vsyncpa [#allocation4], 1 }

</bundles_post_ra>
